<compile_context>
chip_gen: v7x
topology: tpu7x:2x2x1
jax: 0.10.0
libtpu: 0.0.40
codegen_flags: <defaults>
</compile_context>

<pallas_src>
import jax
import jax.numpy as jnp
from jax import lax
from jax.experimental import pallas as pl
from jax.experimental.pallas import tpu as pltpu


def _round_up(x, m):
    return -(-x // m) * m


# ----------------------------------------------------------------------------
# Pallas kernel
# ----------------------------------------------------------------------------
def _make_neumf_kernel(emb_dim, h0, fold_pad, n_mlp_layers, w_offs, b_offs):
    """Fused NeuMF forward kernel.

    Layout: feature-major inside the kernel (batch on the 128-wide lane axis)
    so every matmul output and the final logit store are lane dense.

    Table rows (f32, width ROW_W, gathered by DMA):
        [0:h0]                    layer-0 partial pre-activation (W0 folded in)
        [fold_pad:fold_pad+E]     GMF embedding half
    w_offs[k] = (row, out_k, in_k) into the bf16 weight slab:
        k = 0 .. n-2 : MLP layers 1..n-1 (transposed, [H_k, H_{k-1}])
        k = n-1      : merged output layer  [1, H_last + E]
    b_offs[k] = (row, out_k) into the f32 bias slab, k = 0..n-1 MLP, k = n out.
    """

    def kernel(uid_sm, iid_sm, u_tbl, i_tbl, w_ref, b_ref, out_ref,
               u_buf, i_buf, sem):
        f32 = jnp.float32
        mxu_dt = w_ref.dtype                      # bf16 MXU operand dtype
        tb = out_ref.shape[1]                     # batch tile (lane axis)
        base = pl.program_id(0) * tb              # offset into prefetched ids

        # ---- embedding row gather: per-row DMAs from HBM tables -------------
        # Issue all 2*tb copies first (they overlap each other), then wait.
        def _issue(i, _):
            pltpu.make_async_copy(
                u_tbl.at[uid_sm[base + i]], u_buf.at[i], sem.at[0]).start()
            pltpu.make_async_copy(
                i_tbl.at[iid_sm[base + i]], i_buf.at[i], sem.at[1]).start()
            return None

        def _wait(i, _):
            # Same-sized stand-in descriptors just to decrement the semaphores.
            pltpu.make_async_copy(u_tbl.at[0], u_buf.at[i], sem.at[0]).wait()
            pltpu.make_async_copy(i_tbl.at[0], i_buf.at[i], sem.at[1]).wait()
            return None

        lax.fori_loop(0, tb, _issue, None)
        lax.fori_loop(0, tb, _wait, None)

        # ---- to feature-major: [tb, ROW_W] -> [ROW_W, tb] (cheap XLU) -------
        u_fm = u_buf[...].T
        i_fm = i_buf[...].T

        def w(k):                                 # static, aligned slab slices
            r, o, i = w_offs[k]
            return w_ref[r:r + o, 0:i]            # [o, i] bf16

        def b(k):
            r, o = b_offs[k]
            return b_ref[r:r + o, :]              # [o, 1] f32

        def mm(wk, x):                            # [o,i] @ [i,tb] -> f32 [o,tb]
            return jnp.dot(wk, x.astype(mxu_dt), preferred_element_type=f32)

        # ---- GMF branch: elementwise product in f32 (VPU) --------------------
        gmf = (u_fm[fold_pad:fold_pad + emb_dim] *
               i_fm[fold_pad:fold_pad + emb_dim])                 # [E, tb]

        # ---- MLP tower.  Layer 0 is folded into the tables: add+bias+ReLU ---
        h = jnp.maximum(u_fm[:h0] + i_fm[:h0] + b(0), 0.0)        # [H0, tb]
        for k in range(1, n_mlp_layers):
            h = jnp.maximum(mm(w(k - 1), h) + b(k), 0.0)

        # ---- output layer: one matmul over stacked [mlp_out ; gmf] ----------
        feat = jnp.concatenate([h, gmf], axis=0)                  # [H_last+E, tb]
        out_ref[...] = mm(w(n_mlp_layers - 1), feat) + b(n_mlp_layers)  # [1, tb]

    return kernel


# ----------------------------------------------------------------------------
# Parameter preparation: fold layer 0 into the tables, pack weights & biases
# ----------------------------------------------------------------------------
def prepare_kernel_params(params, mxu_dtype=jnp.bfloat16):
    """Converts canonical f32 params into the kernel's fused/packed layout."""
    emb_dim = params["user_emb_mlp"].shape[1]
    mlp_ws = params["mlp_ws"]                     # list of [in, out] f32
    mlp_bs = params["mlp_bs"]
    n_layers = len(mlp_ws)
    hidden_dims = tuple(int(w.shape[1]) for w in mlp_ws)
    h0 = hidden_dims[0]
    assert mlp_ws[0].shape[0] == 2 * emb_dim, "layers[0] must equal 2*emb_dim"

    fold_pad = _round_up(h0, 8)                   # sublane-aligned GMF offset
    row_w = _round_up(fold_pad + emb_dim, 128)    # full-lane DMA rows

    # ---- fold MLP layer 0 into the embedding tables (offline, f32) ---------
    w0 = mlp_ws[0]                                # [2E, H0]
    u_fold = params["user_emb_mlp"] @ w0[:emb_dim]    # [Nu, H0]
    i_fold = params["item_emb_mlp"] @ w0[emb_dim:]    # [Ni, H0]

    def fuse(fold, gmf):
        n = fold.shape[0]
        t = jnp.zeros((n, row_w), jnp.float32)
        t = t.at[:, :h0].set(fold)
        t = t.at[:, fold_pad:fold_pad + emb_dim].set(gmf)
        return t                                   # stays f32, lives in HBM

    user_table = fuse(u_fold, params["user_emb_gmf"])
    item_table = fuse(i_fold, params["item_emb_gmf"])

    # ---- bf16 weight slab: MLP layers 1..n-1 (transposed) + merged out -----
    pieces = [wk.T for wk in mlp_ws[1:]]           # [H_k, H_{k-1}]
    pieces.append(params["out_w"].T)               # [1, H_last + E]  (merged)
    max_in = _round_up(max(p.shape[1] for p in pieces), 128)
    w_blocks, w_offs, row = [], [], 0
    for p in pieces:
        out_k, in_k = p.shape
        pad_rows = _round_up(out_k, 16)            # bf16 sublane-pack aligned
        blk = jnp.zeros((pad_rows, max_in), jnp.float32).at[:out_k, :in_k].set(p)
        w_blocks.append(blk)
        w_offs.append((row, out_k, in_k))
        row += pad_rows
    w_slab = jnp.concatenate(w_blocks, axis=0).astype(mxu_dtype)

    # ---- f32 bias slab ------------------------------------------------------
    biases = list(mlp_bs) + [params["out_b"]]
    b_blocks, b_offs, row = [], [], 0
    for bias in biases:
        bias = bias.reshape(-1)
        out_k = bias.shape[0]
        pad_rows = _round_up(out_k, 8)
        b_blocks.append(jnp.zeros((pad_rows, 1), jnp.float32).at[:out_k, 0].set(bias))
        b_offs.append((row, out_k))
        row += pad_rows
    b_slab = jnp.concatenate(b_blocks, axis=0)

    prepared = dict(user_table=user_table, item_table=item_table,
                    w_slab=w_slab, b_slab=b_slab)
    meta = dict(emb_dim=emb_dim, h0=h0, fold_pad=fold_pad,
                hidden_dims=hidden_dims,
                w_offs=tuple(w_offs), b_offs=tuple(b_offs))
    return prepared, meta


# ----------------------------------------------------------------------------
# Wrapper
# ----------------------------------------------------------------------------
def neumf_forward_pallas(prepared, user_id, item_id, *, meta, tile_b=512):
    """NeuMF forward: ids in, logits out, one fused Pallas call."""
    emb_dim = meta["emb_dim"]
    hidden = meta["hidden_dims"]
    n_layers = len(hidden)
    fold_pad = meta["fold_pad"]

    u_tbl = prepared["user_table"]
    i_tbl = prepared["item_table"]
    ws = prepared["w_slab"]
    bs = prepared["b_slab"]
    row_w = u_tbl.shape[1]

    batch = user_id.shape[0]
    # Batch tile: multiple of 128 (lane width); prefer >= 2 grid steps so both
    # v7x TensorCores get work; default 512 fills the 256-wide MXU on v6e/v7x.
    tile_b = max(128, _round_up(min(tile_b, _round_up(batch, 128)), 128))
    if _round_up(batch, tile_b) // tile_b < 2 and batch > 128:
        tile_b = max(128, _round_up(_round_up(batch, 128) // 2, 128))
    b_pad = _round_up(batch, tile_b)

    # Clamp ids so padded / out-of-range ids never turn into OOB row DMAs.
    uid = jnp.clip(user_id.astype(jnp.int32), 0, u_tbl.shape[0] - 1)
    iid = jnp.clip(item_id.astype(jnp.int32), 0, i_tbl.shape[0] - 1)
    uid = jnp.pad(uid, (0, b_pad - batch))
    iid = jnp.pad(iid, (0, b_pad - batch))

    kernel = _make_neumf_kernel(emb_dim, meta["h0"], fold_pad, n_layers,
                                meta["w_offs"], meta["b_offs"])

    grid_spec = pltpu.PrefetchScalarGridSpec(
        num_scalar_prefetch=2,                    # uid, iid -> SMEM
        grid=(b_pad // tile_b,),
        in_specs=[
            pl.BlockSpec(memory_space=pl.ANY),    # user table stays in HBM
            pl.BlockSpec(memory_space=pl.ANY),    # item table stays in HBM
            pl.BlockSpec(ws.shape, lambda g, *_: (0, 0)),   # resident slabs
            pl.BlockSpec(bs.shape, lambda g, *_: (0, 0)),
        ],
        out_specs=pl.BlockSpec((1, tile_b), lambda g, *_: (0, g)),
        scratch_shapes=[
            pltpu.VMEM((tile_b, row_w), jnp.float32),       # gathered user rows
            pltpu.VMEM((tile_b, row_w), jnp.float32),       # gathered item rows
            pltpu.SemaphoreType.DMA((2,)),                  # one sem per table
        ],
    )

    # Advisory cost estimate so XLA schedules the surrounding glue well.
    per_sample = emb_dim                                        # GMF products
    prev = hidden[0]
    for hk in hidden[1:]:
        per_sample += 2 * hk * prev
        prev = hk
    per_sample += 2 * (hidden[-1] + emb_dim)                    # merged out layer
    flops = int(per_sample) * int(b_pad)
    bytes_accessed = (int(b_pad) * (2 * row_w * 4 + 2 * 4 + 4)
                      + int(ws.size) * ws.dtype.itemsize
                      + int(bs.size) * bs.dtype.itemsize)

    logits = pl.pallas_call(
        kernel,
        out_shape=jax.ShapeDtypeStruct((1, b_pad), jnp.float32),
        grid_spec=grid_spec,
        compiler_params=pltpu.CompilerParams(
            dimension_semantics=("parallel",),    # batch tiles are independent
        ),
        cost_estimate=pl.CostEstimate(flops=flops, transcendentals=0,
                                      bytes_accessed=bytes_accessed),
    )(uid, iid, u_tbl, i_tbl, ws, bs)

    return logits.reshape(-1)[:batch]             # matches logits.view(-1)


# ----------------------------------------------------------------------------
# Deterministic parameter construction (mirrors NeuMF.__init__ shapes)
# ----------------------------------------------------------------------------
def init_neumf_params(key, num_users, num_items, embedding_dim, layers):
    n_linear = len(layers) - 1
    keys = jax.random.split(key, 6 + 2 * n_linear)

    def nrm(k, shape):
        return 0.01 * jax.random.normal(k, shape, dtype=jnp.float32)

    params = {
        "user_emb_mlp": nrm(keys[0], (num_users, embedding_dim)),
        "item_emb_mlp": nrm(keys[1], (num_items, embedding_dim)),
        "user_emb_gmf": nrm(keys[2], (num_users, embedding_dim)),
        "item_emb_gmf": nrm(keys[3], (num_items, embedding_dim)),
    }

    mlp_ws, mlp_bs = [], []
    for li, (fin, fout) in enumerate(zip(layers[:-1], layers[1:])):
        limit = (6.0 / (fin + fout)) ** 0.5                  # Xavier-uniform
        w = jax.random.uniform(keys[4 + 2 * li], (fin, fout),
                               minval=-limit, maxval=limit, dtype=jnp.float32)
        mlp_ws.append(w)                                     # stored as [in, out]
        # PyTorch zero-inits Linear biases; small random biases here so the
        # kernel's bias-slab path is numerically exercised (review item).
        mlp_bs.append(nrm(keys[5 + 2 * li], (fout,)))

    out_in = layers[-1] + embedding_dim
    bound = (3.0 / out_in) ** 0.5                            # Kaiming-uniform, a=1
    out_w = jax.random.uniform(keys[4 + 2 * n_linear], (out_in, 1),
                               minval=-bound, maxval=bound, dtype=jnp.float32)
    out_b = nrm(keys[5 + 2 * n_linear], (1,))

    params["mlp_ws"] = mlp_ws
    params["mlp_bs"] = mlp_bs
    params["out_w"] = out_w
    params["out_b"] = out_b
    return params


# ----------------------------------------------------------------------------
# Pure-JAX f32 reference: the PyTorch forward verbatim
# (gather -> concat -> Linear/ReLU chain -> concat -> Linear).
# ----------------------------------------------------------------------------
def neumf_forward_ref(params, user_id, item_id):
    u_mlp = params["user_emb_mlp"][user_id]
    i_mlp = params["item_emb_mlp"][item_id]
    u_gmf = params["user_emb_gmf"][user_id]
    i_gmf = params["item_emb_gmf"][item_id]

    mlp_out = jnp.concatenate([u_mlp, i_mlp], axis=-1)
    gmf_out = u_gmf * i_gmf
    for w, b in zip(params["mlp_ws"], params["mlp_bs"]):
        mlp_out = jnp.maximum(mlp_out @ w + b, 0.0)
    feat = jnp.concatenate([mlp_out, gmf_out], axis=-1)
    return (feat @ params["out_w"] + params["out_b"]).reshape(-1)


# ----------------------------------------------------------------------------
if __name__ == "__main__":
    num_users = 64
    num_items = 100
    embedding_dim = 32
    layers = [2 * embedding_dim, 32, 16, 8]      # layers[0] = 2*emb (concat input)
    batch = 500                                  # exercises padding + 2-step grid

    key = jax.random.PRNGKey(0)
    k_params, k_u, k_i = jax.random.split(key, 3)
    params = init_neumf_params(k_params, num_users, num_items, embedding_dim, layers)
    prepared, meta = prepare_kernel_params(params, mxu_dtype=jnp.bfloat16)

    user_id = jax.random.randint(k_u, (batch,), 0, num_users, dtype=jnp.int32)
    item_id = jax.random.randint(k_i, (batch,), 0, num_items, dtype=jnp.int32)

    fwd = jax.jit(lambda prep, u, i: neumf_forward_pallas(prep, u, i, meta=meta))
    out = jax.block_until_ready(fwd(prepared, user_id, item_id))

    ref = neumf_forward_ref(params, user_id, item_id)
    assert out.shape == (batch,)
    # Tolerance covers bf16 weight storage + layer-0 folding reorder; tables and
    # accumulation are f32, so the expected max deviation is ~1e-4.
    max_err = float(jnp.max(jnp.abs(out - ref)))
    assert jnp.allclose(out, ref, atol=5e-4, rtol=2e-2), max_err

    # NOTE: at these toy sizes the call is fixed-overhead dominated; benchmark
    # at batch >= 4K with min-of-N from an xprof trace before tuning further.
    print("KERNEL_OK")
</pallas_src>

<mosaic_0001>
module attributes {stable_mosaic.version = 11 : i64} {
  func.func @kernel(%arg0: i32, %arg1: memref<512xi32, #tpu.memory_space<smem>>, %arg2: memref<512xi32, #tpu.memory_space<smem>>, %arg3: memref<64x128xf32, #tpu.memory_space<any>>, %arg4: memref<100x128xf32, #tpu.memory_space<any>>, %arg5: memref<48x128xbf16, #tpu.memory_space<vmem>>, %arg6: memref<64x1xf32, #tpu.memory_space<vmem>>, %arg7: memref<1x256xf32, #tpu.memory_space<vmem>>, %arg8: memref<256x128xf32, #tpu.memory_space<vmem>>, %arg9: memref<256x128xf32, #tpu.memory_space<vmem>>, %arg10: memref<2x!tpu.dma_semaphore, #tpu.memory_space<semaphore_mem>>) attributes {dimension_semantics = [#tpu.dimension_semantics<parallel>], iteration_bounds = array<i64: 2>, scalar_prefetch = 2 : i64, scratch_operands = 3 : i64, tpu.core_type = #tpu.core_type<tc>, window_params = [{}, {}, {pipeline_mode = #tpu.pipeline_mode<synchronous>, transform_indices = @transform_2, window_bounds = array<i64: 48, 128>}, {pipeline_mode = #tpu.pipeline_mode<synchronous>, transform_indices = @transform_3, window_bounds = array<i64: 64, 1>}, {transform_indices = @transform_4, window_bounds = array<i64: 1, 256>}]} {
    %c256_i32 = arith.constant 256 : i32
    %0 = arith.muli %arg0, %c256_i32 : i32
    %c0_i32 = arith.constant 0 : i32
    %c256_i32_0 = arith.constant 256 : i32
    %1 = arith.addi %c0_i32, %c256_i32_0 : i32
    %c1_i32 = arith.constant 1 : i32
    scf.for %arg11 = %c0_i32 to %1 step %c1_i32  : i32 {
      %42 = arith.addi %0, %arg11 : i32
      %43 = arith.index_cast %42 : i32 to index
      %44 = memref.load %arg1[%43] : memref<512xi32, #tpu.memory_space<smem>>
      %c0_i32_26 = arith.constant 0 : i32
      %c0_i32_27 = arith.constant 0 : i32
      %45 = tpu.memref_slice %arg3[%44, %c0_i32_27] : memref<64x128xf32, #tpu.memory_space<any>> -> memref<1x128xf32, #tpu.memory_space<any>>
      %46 = tpu.memref_squeeze %45 : memref<1x128xf32, #tpu.memory_space<any>> -> memref<128xf32, #tpu.memory_space<any>>
      %c0_i32_28 = arith.constant 0 : i32
      %47 = tpu.memref_slice %arg8[%arg11, %c0_i32_28] : memref<256x128xf32, #tpu.memory_space<vmem>> -> memref<1x128xf32, #tpu.memory_space<vmem>>
      %48 = tpu.memref_squeeze %47 : memref<1x128xf32, #tpu.memory_space<vmem>> -> memref<128xf32, #tpu.memory_space<vmem>>
      %49 = tpu.memref_slice %arg10[%c0_i32_26] : memref<2x!tpu.dma_semaphore, #tpu.memory_space<semaphore_mem>> -> memref<1x!tpu.dma_semaphore, #tpu.memory_space<semaphore_mem>>
      %50 = tpu.memref_squeeze %49 : memref<1x!tpu.dma_semaphore, #tpu.memory_space<semaphore_mem>> -> memref<!tpu.dma_semaphore, #tpu.memory_space<semaphore_mem>>
      tpu.enqueue_dma source(%46 : memref<128xf32, #tpu.memory_space<any>>) target(%48 : memref<128xf32, #tpu.memory_space<vmem>>) target_semaphore(%50 : memref<!tpu.dma_semaphore, #tpu.memory_space<semaphore_mem>>)
      %51 = arith.addi %0, %arg11 : i32
      %52 = arith.index_cast %51 : i32 to index
      %53 = memref.load %arg2[%52] : memref<512xi32, #tpu.memory_space<smem>>
      %c1_i32_29 = arith.constant 1 : i32
      %c0_i32_30 = arith.constant 0 : i32
      %54 = tpu.memref_slice %arg4[%53, %c0_i32_30] : memref<100x128xf32, #tpu.memory_space<any>> -> memref<1x128xf32, #tpu.memory_space<any>>
      %55 = tpu.memref_squeeze %54 : memref<1x128xf32, #tpu.memory_space<any>> -> memref<128xf32, #tpu.memory_space<any>>
      %c0_i32_31 = arith.constant 0 : i32
      %56 = tpu.memref_slice %arg9[%arg11, %c0_i32_31] : memref<256x128xf32, #tpu.memory_space<vmem>> -> memref<1x128xf32, #tpu.memory_space<vmem>>
      %57 = tpu.memref_squeeze %56 : memref<1x128xf32, #tpu.memory_space<vmem>> -> memref<128xf32, #tpu.memory_space<vmem>>
      %58 = tpu.memref_slice %arg10[%c1_i32_29] : memref<2x!tpu.dma_semaphore, #tpu.memory_space<semaphore_mem>> -> memref<1x!tpu.dma_semaphore, #tpu.memory_space<semaphore_mem>>
      %59 = tpu.memref_squeeze %58 : memref<1x!tpu.dma_semaphore, #tpu.memory_space<semaphore_mem>> -> memref<!tpu.dma_semaphore, #tpu.memory_space<semaphore_mem>>
      tpu.enqueue_dma source(%55 : memref<128xf32, #tpu.memory_space<any>>) target(%57 : memref<128xf32, #tpu.memory_space<vmem>>) target_semaphore(%59 : memref<!tpu.dma_semaphore, #tpu.memory_space<semaphore_mem>>)
    }
    %c256_i32_1 = arith.constant 256 : i32
    %c0_i32_2 = arith.constant 0 : i32
    %c256_i32_3 = arith.constant 256 : i32
    %2 = arith.addi %c0_i32_2, %c256_i32_3 : i32
    %c1_i32_4 = arith.constant 1 : i32
    scf.for %arg11 = %c0_i32_2 to %2 step %c1_i32_4  : i32 {
      %c0_i32_26 = arith.constant 0 : i32
      %c0_i32_27 = arith.constant 0 : i32
      %c0_i32_28 = arith.constant 0 : i32
      %42 = tpu.memref_slice %arg3[%c0_i32_26, %c0_i32_28] : memref<64x128xf32, #tpu.memory_space<any>> -> memref<1x128xf32, #tpu.memory_space<any>>
      %43 = tpu.memref_squeeze %42 : memref<1x128xf32, #tpu.memory_space<any>> -> memref<128xf32, #tpu.memory_space<any>>
      %c0_i32_29 = arith.constant 0 : i32
      %44 = tpu.memref_slice %arg8[%arg11, %c0_i32_29] : memref<256x128xf32, #tpu.memory_space<vmem>> -> memref<1x128xf32, #tpu.memory_space<vmem>>
      %45 = tpu.memref_squeeze %44 : memref<1x128xf32, #tpu.memory_space<vmem>> -> memref<128xf32, #tpu.memory_space<vmem>>
      %46 = tpu.memref_slice %arg10[%c0_i32_27] : memref<2x!tpu.dma_semaphore, #tpu.memory_space<semaphore_mem>> -> memref<1x!tpu.dma_semaphore, #tpu.memory_space<semaphore_mem>>
      %47 = tpu.memref_squeeze %46 : memref<1x!tpu.dma_semaphore, #tpu.memory_space<semaphore_mem>> -> memref<!tpu.dma_semaphore, #tpu.memory_space<semaphore_mem>>
      tpu.wait_dma2 semaphore(%47 : memref<!tpu.dma_semaphore, #tpu.memory_space<semaphore_mem>>) src(%43 : memref<128xf32, #tpu.memory_space<any>>) dst(%45 : memref<128xf32, #tpu.memory_space<vmem>>)
      %c0_i32_30 = arith.constant 0 : i32
      %c1_i32_31 = arith.constant 1 : i32
      %c0_i32_32 = arith.constant 0 : i32
      %48 = tpu.memref_slice %arg4[%c0_i32_30, %c0_i32_32] : memref<100x128xf32, #tpu.memory_space<any>> -> memref<1x128xf32, #tpu.memory_space<any>>
      %49 = tpu.memref_squeeze %48 : memref<1x128xf32, #tpu.memory_space<any>> -> memref<128xf32, #tpu.memory_space<any>>
      %c0_i32_33 = arith.constant 0 : i32
      %50 = tpu.memref_slice %arg9[%arg11, %c0_i32_33] : memref<256x128xf32, #tpu.memory_space<vmem>> -> memref<1x128xf32, #tpu.memory_space<vmem>>
      %51 = tpu.memref_squeeze %50 : memref<1x128xf32, #tpu.memory_space<vmem>> -> memref<128xf32, #tpu.memory_space<vmem>>
      %52 = tpu.memref_slice %arg10[%c1_i32_31] : memref<2x!tpu.dma_semaphore, #tpu.memory_space<semaphore_mem>> -> memref<1x!tpu.dma_semaphore, #tpu.memory_space<semaphore_mem>>
      %53 = tpu.memref_squeeze %52 : memref<1x!tpu.dma_semaphore, #tpu.memory_space<semaphore_mem>> -> memref<!tpu.dma_semaphore, #tpu.memory_space<semaphore_mem>>
      tpu.wait_dma2 semaphore(%53 : memref<!tpu.dma_semaphore, #tpu.memory_space<semaphore_mem>>) src(%49 : memref<128xf32, #tpu.memory_space<any>>) dst(%51 : memref<128xf32, #tpu.memory_space<vmem>>)
    }
    %c256_i32_5 = arith.constant 256 : i32
    %c0 = arith.constant 0 : index
    %c0_6 = arith.constant 0 : index
    %3 = vector.load %arg8[%c0, %c0_6] : memref<256x128xf32, #tpu.memory_space<vmem>>, vector<256x128xf32>
    %4 = tpu.transpose %3, [1, 0] : vector<256x128xf32> -> vector<128x256xf32>
    %c0_7 = arith.constant 0 : index
    %c0_8 = arith.constant 0 : index
    %5 = vector.load %arg9[%c0_7, %c0_8] : memref<256x128xf32, #tpu.memory_space<vmem>>, vector<256x128xf32>
    %6 = tpu.transpose %5, [1, 0] : vector<256x128xf32> -> vector<128x256xf32>
    %7 = vector.extract_strided_slice %4 {offsets = [32, 0], sizes = [32, 256], strides = [1, 1]} : vector<128x256xf32> to vector<32x256xf32>
    %8 = vector.extract_strided_slice %6 {offsets = [32, 0], sizes = [32, 256], strides = [1, 1]} : vector<128x256xf32> to vector<32x256xf32>
    %9 = arith.mulf %7, %8 : vector<32x256xf32>
    %10 = vector.extract_strided_slice %4 {offsets = [0, 0], sizes = [32, 256], strides = [1, 1]} : vector<128x256xf32> to vector<32x256xf32>
    %11 = vector.extract_strided_slice %6 {offsets = [0, 0], sizes = [32, 256], strides = [1, 1]} : vector<128x256xf32> to vector<32x256xf32>
    %12 = arith.addf %10, %11 : vector<32x256xf32>
    %c0_9 = arith.constant 0 : index
    %c0_10 = arith.constant 0 : index
    %13 = vector.load %arg6[%c0_9, %c0_10] : memref<64x1xf32, #tpu.memory_space<vmem>>, vector<32x1xf32>
    %14 = vector.broadcast %13 : vector<32x1xf32> to vector<32x256xf32>
    %15 = arith.addf %12, %14 : vector<32x256xf32>
    %cst = arith.constant 0.000000e+00 : f32
    %16 = vector.broadcast %cst : f32 to vector<32x256xf32>
    %17 = arith.maximumf %15, %16 : vector<32x256xf32>
    %c0_11 = arith.constant 0 : index
    %c0_12 = arith.constant 0 : index
    %18 = vector.load %arg5[%c0_11, %c0_12] : memref<48x128xbf16, #tpu.memory_space<vmem>>, vector<16x32xbf16>
    %19 = arith.truncf %17 : vector<32x256xf32> to vector<32x256xbf16>
    %cst_13 = arith.constant dense<0.000000e+00> : vector<16x256xf32>
    %20 = tpu.matmul %18, %19, %cst_13 {dimension_numbers = #tpu.dot_dimension_numbers<[1], [0], [0], [1], [0, 0, 1, 1], [], []>} : vector<16x32xbf16>, vector<32x256xbf16>, vector<16x256xf32> -> vector<16x256xf32>
    %c32 = arith.constant 32 : index
    %c0_14 = arith.constant 0 : index
    %21 = vector.load %arg6[%c32, %c0_14] : memref<64x1xf32, #tpu.memory_space<vmem>>, vector<16x1xf32>
    %22 = vector.broadcast %21 : vector<16x1xf32> to vector<16x256xf32>
    %23 = arith.addf %20, %22 : vector<16x256xf32>
    %cst_15 = arith.constant 0.000000e+00 : f32
    %24 = vector.broadcast %cst_15 : f32 to vector<16x256xf32>
    %25 = arith.maximumf %23, %24 : vector<16x256xf32>
    %c16 = arith.constant 16 : index
    %c0_16 = arith.constant 0 : index
    %26 = vector.load %arg5[%c16, %c0_16] : memref<48x128xbf16, #tpu.memory_space<vmem>>, vector<8x16xbf16>
    %27 = arith.truncf %25 : vector<16x256xf32> to vector<16x256xbf16>
    %cst_17 = arith.constant dense<0.000000e+00> : vector<8x256xf32>
    %28 = tpu.matmul %26, %27, %cst_17 {dimension_numbers = #tpu.dot_dimension_numbers<[1], [0], [0], [1], [0, 0, 1, 1], [], []>} : vector<8x16xbf16>, vector<16x256xbf16>, vector<8x256xf32> -> vector<8x256xf32>
    %c48 = arith.constant 48 : index
    %c0_18 = arith.constant 0 : index
    %29 = vector.load %arg6[%c48, %c0_18] : memref<64x1xf32, #tpu.memory_space<vmem>>, vector<8x1xf32>
    %30 = vector.broadcast %29 : vector<8x1xf32> to vector<8x256xf32>
    %31 = arith.addf %28, %30 : vector<8x256xf32>
    %cst_19 = arith.constant 0.000000e+00 : f32
    %32 = vector.broadcast %cst_19 : f32 to vector<8x256xf32>
    %33 = arith.maximumf %31, %32 : vector<8x256xf32>
    %34 = tpu.concatenate %33, %9 in 0 : vector<8x256xf32>, vector<32x256xf32> -> vector<40x256xf32>
    %c32_20 = arith.constant 32 : index
    %c0_21 = arith.constant 0 : index
    %35 = vector.load %arg5[%c32_20, %c0_21] : memref<48x128xbf16, #tpu.memory_space<vmem>>, vector<1x40xbf16>
    %36 = arith.truncf %34 : vector<40x256xf32> to vector<40x256xbf16>
    %cst_22 = arith.constant dense<0.000000e+00> : vector<1x256xf32>
    %37 = tpu.matmul %35, %36, %cst_22 {dimension_numbers = #tpu.dot_dimension_numbers<[1], [0], [0], [1], [0, 0, 1, 1], [], []>} : vector<1x40xbf16>, vector<40x256xbf16>, vector<1x256xf32> -> vector<1x256xf32>
    %c56 = arith.constant 56 : index
    %c0_23 = arith.constant 0 : index
    %38 = vector.load %arg6[%c56, %c0_23] : memref<64x1xf32, #tpu.memory_space<vmem>>, vector<1x1xf32>
    %39 = vector.broadcast %38 : vector<1x1xf32> to vector<1x256xf32>
    %40 = arith.addf %37, %39 : vector<1x256xf32>
    %c0_24 = arith.constant 0 : index
    %c0_25 = arith.constant 0 : index
    %41 = vector.load %arg7[%c0_24, %c0_25] : memref<1x256xf32, #tpu.memory_space<vmem>>, vector<1x256xf32>
    tpu.vector_store %arg7[%c0_24, %c0_25], %40 {strides = array<i32>} : memref<1x256xf32, #tpu.memory_space<vmem>>, vector<1x256xf32>,
    return
  }
  func.func @transform_2(%arg0: i32, %arg1: memref<512xi32, #tpu.memory_space<smem>>, %arg2: memref<512xi32, #tpu.memory_space<smem>>) -> (i32, i32) {
    %c0_i32 = arith.constant 0 : i32
    %c0_i32_0 = arith.constant 0 : i32
    %c0_i32_1 = arith.constant 0 : i32
    return %c0_i32, %c0_i32_0 : i32, i32
  }
  func.func @transform_3(%arg0: i32, %arg1: memref<512xi32, #tpu.memory_space<smem>>, %arg2: memref<512xi32, #tpu.memory_space<smem>>) -> (i32, i32) {
    %c0_i32 = arith.constant 0 : i32
    %c0_i32_0 = arith.constant 0 : i32
    %c0_i32_1 = arith.constant 0 : i32
    return %c0_i32, %c0_i32_0 : i32, i32
  }
  func.func @transform_4(%arg0: i32, %arg1: memref<512xi32, #tpu.memory_space<smem>>, %arg2: memref<512xi32, #tpu.memory_space<smem>>) -> (i32, i32) {
    %c0_i32 = arith.constant 0 : i32
    %c0_i32_0 = arith.constant 0 : i32
    return %c0_i32, %arg0 : i32, i32
  }
}

</mosaic_0001>

<bundles_post_ra>
// kernel: _lambda_.1
= control target key start
LH: loop header
LB: loop body
LE: loop exit
PB: predicated region body
PF: predicated region fallthrough
CT: control target
= control target key end

     0   :  { %s1242_s0 = inlined_call_operand.vmem [shape: s32[512], index: 0, kind: input, shape index: {}]   ;;  %s1243_s2 = inlined_call_operand.vmem [shape: f32[64,128], index: 2, kind: input, shape index: {}]   ;;  %s1244_s3 = inlined_call_operand.hbm [shape: f32[100,128], index: 3, kind: input, shape index: {}]   ;;  %s1245_s4 = inlined_call_operand.vmem [shape: bf16[48,128], index: 4, kind: input, shape index: {}]   ;;  %s1246_s5 = inlined_call_operand.vmem [shape: f32[64,1], index: 5, kind: input, shape index: {}]   ;;  %s1247_s6 = inlined_call_operand.hbm [shape: f32[1,512], index: 6, kind: output, shape index: {}]   ;;  %s1248_s1 = inlined_call_operand.vmem [shape: s32[512], index: 1, kind: input, shape index: {}]  }
   0x1   :  { %s11_s23 = sshll.u32 %s1242_s0, 4  ;;  %s15_s26 = sshll.u32 %s1248_s1, 4  ;;  %s12_s23 = int_to_ptr.vmem [resolvable:$true] %s11_s23  ;;  %s16_s26 = int_to_ptr.vmem [resolvable:$true] %s15_s26 }
   0x2   :  { %s867_s27 = scalar_lea.vmem %s12_s23, 64  ;;  %p872_p1 = scmp.lt.s32.totalorder %s12_s23, %s12_s23 }
   0x3   :  { %p868_p0 = scmp.ne.s32.totalorder %s12_s23, %s867_s27  ;;  %p873_p2 = scmp.lt.s32.totalorder %s867_s27, %s867_s27 }
   0x5   :  { %p874_p3 = por %p873_p2, %p872_p1 }
   0x7   :  { %p875_p4 = pnand %p874_p3, %p868_p0 }
   0x9   :  { %878 = shalt.err (!%p875_p4)  }
   0xa   :  { %s1001_s28 = smov [#allocation6]   ;;  %s879_s29 = scalar_lea.vmem %s16_s26, 64 }
   0xb   :  { %14 = dma.vmem_to_smem %s12_s23, 64, %s1001_s28, [#allocation5] }
   0xc   :  { %p880_p5 = scmp.ne.s32.totalorder %s16_s26, %s879_s29  ;;  %p884_p6 = scmp.lt.s32.totalorder %s16_s26, %s16_s26 }
   0xd   :  { %p885_p7 = scmp.lt.s32.totalorder %s879_s29, %s879_s29 }
   0xf   :  { %p886_p8 = por %p885_p7, %p884_p6 }
  0x11   :  { %p887_p9 = pnand %p886_p8, %p880_p5 }
  0x13   :  { %890 = shalt.err (!%p887_p9)  }
  0x14   :  { %s1002_s0 = smov [#allocation7]  }
  0x15   :  { %18 = dma.vmem_to_smem %s16_s26, 64, %s1002_s0, [#allocation5] }
  0x16   :  { %967 = dma.done.wait [#allocation5], 128 }
  0x17   :  { %968 = vsyncadd [#allocation5], 4294967168 }
  0x18   :  { %20 = sfence }
  0x19   :  { %21 = vsyncpa [#allocation9], 0 }
  0x1a   :  { %23 = vsyncpa [#allocation9 + $0x1], 0  ;;  %s1048_s1 = smov 0   ;;  %s1050_s30 = smov 0  }
  0x1b   :  { %s1052_s7 = smov 0   ;;  %s1054_s8 = smov 0  }
  0x1c LB: > { %s1069_s9 = sadd.s32 4294967295, %s991_s8   ;;  %s786_s10 = sadd.s32 4294967294, %s991_s8   ;;  %s991_s8 = sphi %s1054_s8, %s1262_s8   ;;  %s987_s7 = sphi %s1052_s7, %s1261_s7   ;;  %s983_s30 = sphi %s1050_s30, %s1260_s30   ;;  %s979_s1 = sphi %s1048_s1, %s1259_s1  }
  0x1d   : > { %s1073_s11 = sadd.s32 1, %s991_s8   ;;  %s78_s12 = sadd.s32 1, %s987_s7 }
  0x1e   : > { %s75_s13 = ssub.s32 %s991_s8, %s1073_s11  ;;  %p88_p10 = scmp.ne.s32.totalorder %s987_s7, %s983_s30 }
  0x1f   : > { %p76_p11 = scmp.eq.s32.totalorder %s75_s13, 0  ;;  %p89_p12 = scmp.eq.s32.totalorder %s1069_s9, 1 }
  0x20   : > { %p94_p13 = scmp.ne.s32.totalorder %s983_s30, %s979_s1  ;;  %p95_p0 = scmp.eq.s32.totalorder %s786_s10, 1 }
  0x21   : > { %s1084_s14 = scalar_select %p76_p11, %s987_s7, %s78_s12  }
  0x22   : > { %p1086_p1 = por %p89_p12, %p88_p10  ;;  %p1090_p2 = por %p95_p0, %p94_p13 }
  0x23   : > { %1250 = sst [smem:[#allocation19_spill]] %s1084_s14  ;;  %p788_p3 = scmp.ge.s32.totalorder %s991_s8, 1 }
  0x24   : > { %s1252_s16 = scalar_select %p1090_p2, 1, 0 }
  0x25   : > { %p119_p4 = scmp.lt.s32.totalorder %s991_s8, 3 }
  0x27   : > { %p120_p5 = pnand %p788_p3, %p119_p4 }
  0x28   : > { %s1249_s17 = sand.u32 (!%p120_p5), 1, %s983_s30   ;;  %s1103_s21 = smov (!%p120_p5), 0  }
  0x29   : > { %123 = sbr.rel (%p120_p5) target bundleno = 1057 (0x421), region = 28  ;;  %s1100_s19 = sshll.u32 (!%p120_p5), %s1249_s17, 1 }
  0x30 LB: >> { %s1253_s18 = sshll.u32 %s1069_s9, 8  ;;  %s148_s27 = scalar_lea.vmem [#allocation2], %s995_s21  ;;  %s995_s21 = sphi %s1103_s21, %s144_s21  }
  0x31   : >> { %s145_s22 = sadd.s32 %s995_s21, %s1253_s18 }
  0x32   : >> { %s146_s23 = sld [smem:[#allocation6 + %s145_s22]] }
  0x38   : >> { %s147_s26 = scalar_lea.vmem %s1243_s2, %s146_s23 }
  0x39   : >> { %v166_v0 = vld [vmem:[%s147_s26] sm:$0x1] }
  0x3a   : >> { %167 = vst [vmem:[%s148_s27] sm:$0x1] %v166_v0 }
  0x3b   : >> { %192 = vsyncadd [#allocation4], 16  ;;  %s193_s28 = sld [smem:[#allocation7 + %s145_s22]]  ;;  %s196_s29 = scalar_lea.vmem [#allocation3], %s995_s21 }
  0x3c   : >> { %s205_s0 = sshll.u32 %s196_s29, 4  ;;  %s893_s23 = scalar_lea.hbm %s1244_s3, 1664  ;;  %s206_s0 = int_to_ptr.vmem [resolvable:$true] %s205_s0 }
  0x41   : >> { %s791_s10 = sshll.u32 %s193_s28, 4 }
  0x42   : >> { %s195_s17 = scalar_lea.hbm %s1244_s3, %s791_s10 }
  0x43   : >> { %s891_s18 = scalar_lea.hbm %s195_s17, 16  ;;  %p894_p7 = scmp.lt.u32.totalorder %s195_s17, %s1244_s3 }
  0x44   : >> { %p892_p6 = scmp.ne.s32.totalorder %s195_s17, %s891_s18  ;;  %p895_p8 = scmp.lt.u32.totalorder %s893_s23, %s891_s18 }
  0x45   : >> { %p897_p10 = scmp.lt.u32.totalorder %s891_s18, %s195_s17 }
  0x46   : >> { %p896_p9 = por %p895_p8, %p894_p7 }
  0x48   : >> { %p898_p11 = por %p897_p10, %p896_p9 }
  0x4a   : >> { %p899_p12 = pnand %p898_p11, %p892_p6 }
  0x4c   : >> { %902 = shalt.err (!%p899_p12)  }
  0x4d   : >> { %s903_s22 = scalar_lea.vmem %s206_s0, 16  ;;  %s1003_s26 = smov [#allocation3]  }
  0x4e   : >> { %p904_p13 = scmp.ne.s32.totalorder %s206_s0, %s903_s22  ;;  %s905_s27 = sshll.u32 %s1003_s26, 4  ;;  %s906_s27 = int_to_ptr.vmem [resolvable:$false] %s905_s27 }
  0x4f   : >> { %s907_s28 = scalar_lea.vmem %s906_s27, 4096  ;;  %p908_p0 = scmp.lt.s32.totalorder %s206_s0, %s906_s27 }
  0x50   : >> { %p909_p3 = scmp.lt.s32.totalorder %s907_s28, %s903_s22 }
  0x52   : >> { %p910_p4 = por %p909_p3, %p908_p0 }
  0x54   : >> { %p911_p5 = pnand %p910_p4, %p904_p13 }
  0x56   : >> { %914 = shalt.err (!%p911_p5)  }
  0x57   : >> { %208 = dma.hbm_to_vmem [thread:$0]  %s195_s17, 16, %s206_s0, [#allocation4 + $0x1] }
  0x58   : >> { %s144_s21 = sadd.s32 1, %s995_s21  }
  0x59   : >> { %p141_p2 = scmp.ge.s32.totalorder %s144_s21, 256  }
  0x5a   : > { %s997_s14 = smov (%p141_p2), 0  }
  0x5b   : > { %143 = sbr.rel (!%p141_p2) target bundleno = 48 (0x30), region = 125 }
  0x62 LB: >> { %969 = dma.done.wait [#allocation4], 16  ;;  %s999_s14 = sphi %s997_s14, %s214_s14  }
  0x63   : >> { %970 = vsyncadd [#allocation4], 4294967280 }
  0x64   : >> { %971 = dma.done.wait [#allocation4 + $0x1], 16 }
  0x65   : >> { %972 = vsyncadd [#allocation4 + $0x1], 4294967280  ;;  %s214_s14 = sadd.s32 1, %s999_s14  }
  0x66   : >> { %p211_p6 = scmp.ge.s32.totalorder %s214_s14, 256  }
  0x67   : > { %v430_v1 = vld [vmem:[%s1246_s5 + $0x10] sm:$0xff] (%p211_p6)  ;;  %v428_v2 = vld [vmem:[%s1246_s5] sm:$0xff] (%p211_p6)  ;;  %v1004_v3 = vmov (%p211_p6), 0   ;;  %v431_v4 = vld [vmem:[%s1246_s5 + $0x18] sm:$0xff] (%p211_p6)  ;;  %vm491_vm0 = vcmask (%p211_p6), 261120   ;;  %vm551_vm1 = vcmask (%p211_p6), 130048  }
  0x68   : > { %213 = sbr.rel (!%p211_p6) target bundleno = 98 (0x62), region = 136  ;;  %865 = vset.pattern.permute.xlu1 (%p211_p6), %v1004_v3  ;;  %864 = vset.pattern.permute.xlu0 (%p211_p6), %v1004_v3  ;;  %v429_v5 = vld [vmem:[%s1246_s5 + $0x8] sm:$0xff] (%p211_p6)  ;;  %v236_v6 = vld [vmem:[#allocation2 + $0x80] sm:$0xff] (%p211_p6)  ;;  %v238_v8 = vld [vmem:[#allocation2 + $0x90] sm:$0xff] (%p211_p6)  ;;  %vm615_vm2 = vcmask (%p211_p6), 1043456   ;;  %vm611_vm3 = vcmask (%p211_p6), 326656  }
  0x69   : > { %444 = vperm.xlu1 (%p211_p6), %865, %v430_v1   ;;  %434 = vperm.xlu0 (%p211_p6), %864, %v428_v2   ;;  %v237_v7 = vld [vmem:[#allocation2 + $0x88] sm:$0xff] (%p211_p6)  ;;  %v332_v9 = vld [vmem:[#allocation3 + $0x80] sm:$0xff] (%p211_p6)  ;;  %v239_v10 = vld [vmem:[#allocation2 + $0x98] sm:$0xff] (%p211_p6)  ;;  %s804_s0 = sshll.u32 (%p211_p6), %s1069_s9, 5  ;;  %s1254_s10 = scalar_lea.vmem (%p211_p6), [#allocation8], %s1100_s19 }
  0x6a   : > { %527 = vmatprep.mubr.bf16.mxu0 (%p211_p6), %v1004_v3  ;;  %587 = vmatprep.mubr.bf16.mxu1 (%p211_p6), %v1004_v3  ;;  %v333_v11 = vld [vmem:[#allocation3 + $0x88] sm:$0xff] (%p211_p6)  ;;  %v240_v12 = vld [vmem:[#allocation2 + $0xa0] sm:$0xff] (%p211_p6)  ;;  %v334_v13 = vld [vmem:[#allocation3 + $0x90] sm:$0xff] (%p211_p6)  ;;  %s701_s12 = sshll.u32 (%p211_p6), %s1254_s10, 4  ;;  %s1196_s24 = scalar_lea.hbm (%p211_p6), %s1247_s6, %s804_s0  ;;  %s1198_s12 = int_to_ptr.vmem [resolvable:$true] %s701_s12 }
  0x6b   : > { %v241_v14 = vld [vmem:[#allocation2 + $0xa8] sm:$0xff] (%p211_p6)  ;;  %v335_v15 = vld [vmem:[#allocation3 + $0x98] sm:$0xff] (%p211_p6)  ;;  %v242_v16 = vld [vmem:[#allocation2 + $0xb0] sm:$0xff] (%p211_p6)  ;;  %s1255_s25 = smov (%p211_p6), %s1254_s10  ;;  %s1256_s22 = sand.u32 (%p211_p6), 1, %s983_s30  }
  0x6c   : > { %v336_v17 = vld [vmem:[#allocation3 + $0xa0] sm:$0xff] (%p211_p6)  ;;  %v243_v18 = vld [vmem:[#allocation2 + $0xb8] sm:$0xff] (%p211_p6)  ;;  %v337_v19 = vld [vmem:[#allocation3 + $0xa8] sm:$0xff] (%p211_p6)  ;;  %s687_s26 = scalar_lea.sflag (%p211_p6), [#allocation9], %s1256_s22  ;;  %s915_s9 = scalar_lea.vmem (%p211_p6), %s1198_s12, 32 }
  0x6d   : > { %449 = vperm.xlu1 (%p211_p6), %865, %v431_v4   ;;  %439 = vperm.xlu0 (%p211_p6), %864, %v429_v5   ;;  %v244_v20 = vld [vmem:[#allocation2 + $0xc0] sm:$0xff] (%p211_p6)  ;;  %v338_v21 = vld [vmem:[#allocation3 + $0xb0] sm:$0xff] (%p211_p6)  ;;  %v245_v22 = vld [vmem:[#allocation2 + $0xc8] sm:$0xff] (%p211_p6)  ;;  %p916_p2 = scmp.ne.s32.totalorder (%p211_p6), %s1198_s12, %s915_s9  ;;  %s1006_s27 = smov (%p211_p6), [#allocation8]  }
  0x6e   : > { %v339_v23 = vld [vmem:[#allocation3 + $0xb8] sm:$0xff] (%p211_p6)  ;;  %v246_v24 = vld [vmem:[#allocation2 + $0xd0] sm:$0xff] (%p211_p6)  ;;  %v340_v25 = vld [vmem:[#allocation3 + $0xc0] sm:$0xff] (%p211_p6)  ;;  %s919_s28 = sshll.u32 (%p211_p6), %s1006_s27, 4  ;;  %s920_s28 = int_to_ptr.vmem [resolvable:$false] %s919_s28 }
  0x6f   : > { %v247_v26 = vld [vmem:[#allocation2 + $0xd8] sm:$0xff]  ;;  %v341_v27 = vld [vmem:[#allocation3 + $0xc8] sm:$0xff]  ;;  %v248_v28 = vld [vmem:[#allocation2 + $0xe0] sm:$0xff]  ;;  %p917_p7 = pnand %p916_p2, %p1086_p1  ;;  %s921_s14 = scalar_lea.vmem %s920_s28, 64 }
  0x70   : > { %v342_v29 = vld [vmem:[#allocation3 + $0xd0] sm:$0xff]  ;;  %v249_v30 = vld [vmem:[#allocation2 + $0xe8] sm:$0xff]  ;;  %v343_v31 = vld [vmem:[#allocation3 + $0xd8] sm:$0xff]  ;;  %p922_p9 = scmp.lt.s32.totalorder %s1198_s12, %s920_s28  ;;  %p923_p10 = scmp.lt.s32.totalorder %s921_s14, %s915_s9 }
  0x71   : > { %v250_v32 = vld [vmem:[#allocation2 + $0xf0] sm:$0xff]  ;;  %v344_v33 = vld [vmem:[#allocation3 + $0xe0] sm:$0xff]  ;;  %v251_v34 = vld [vmem:[#allocation2 + $0xf8] sm:$0xff]  ;;  %p918_p8 = pneg %p917_p7 }
  0x72   : > { %v345_v35 = vld [vmem:[#allocation3 + $0xe8] sm:$0xff]  ;;  %v220_v36 = vld [vmem:[#allocation2] sm:$0xff]  ;;  %v346_v37 = vld [vmem:[#allocation3 + $0xf0] sm:$0xff]  ;;  %p924_p11 = por %p923_p10, %p922_p9 }
  0x73   : > { %v221_v38 = vld [vmem:[#allocation2 + $0x8] sm:$0xff]  ;;  %v347_v39 = vld [vmem:[#allocation3 + $0xf8] sm:$0xff]  ;;  %v222_v40 = vld [vmem:[#allocation2 + $0x10] sm:$0xff] }
  0x74   : > { %v316_v41 = vld [vmem:[#allocation3] sm:$0xff]  ;;  %v223_v42 = vld [vmem:[#allocation2 + $0x18] sm:$0xff]  ;;  %v317_v43 = vld [vmem:[#allocation3 + $0x8] sm:$0xff]  ;;  %p925_p12 = pnand %p924_p11, %p918_p8 }
  0x75   : > { %v224_v44 = vld [vmem:[#allocation2 + $0x20] sm:$0xff]  ;;  %v318_v45 = vld [vmem:[#allocation3 + $0x10] sm:$0xff]  ;;  %v225_v46 = vld [vmem:[#allocation2 + $0x28] sm:$0xff] }
  0x76   : > { %v319_v47 = vld [vmem:[#allocation3 + $0x18] sm:$0xff]  ;;  %v226_v48 = vld [vmem:[#allocation2 + $0x30] sm:$0xff]  ;;  %v320_v49 = vld [vmem:[#allocation3 + $0x20] sm:$0xff] }
  0x77   : > { %v227_v50 = vld [vmem:[#allocation2 + $0x38] sm:$0xff]  ;;  %v321_v51 = vld [vmem:[#allocation3 + $0x28] sm:$0xff]  ;;  %v228_v52 = vld [vmem:[#allocation2 + $0x40] sm:$0xff] }
  0x78   : > { %v322_v53 = vld [vmem:[#allocation3 + $0x30] sm:$0xff]  ;;  %v229_v54 = vld [vmem:[#allocation2 + $0x48] sm:$0xff]  ;;  %v323_v55 = vld [vmem:[#allocation3 + $0x38] sm:$0xff] }
  0x79   : > { %v230_v56 = vld [vmem:[#allocation2 + $0x50] sm:$0xff]  ;;  %v324_v57 = vld [vmem:[#allocation3 + $0x40] sm:$0xff]  ;;  %v231_v58 = vld [vmem:[#allocation2 + $0x58] sm:$0xff] }
  0x7a   : > { %v325_v59 = vld [vmem:[#allocation3 + $0x48] sm:$0xff]  ;;  %v232_v60 = vld [vmem:[#allocation2 + $0x60] sm:$0xff]  ;;  %v326_v61 = vld [vmem:[#allocation3 + $0x50] sm:$0xff] }
  0x7b   : > { %v233_v62 = vld [vmem:[#allocation2 + $0x68] sm:$0xff]  ;;  %v327_v63 = vld [vmem:[#allocation3 + $0x58] sm:$0xff]  ;;  %v234_v0 = vld [vmem:[#allocation2 + $0x70] sm:$0xff] }
  0x7c   : > { %v328_v2 = vld [vmem:[#allocation3 + $0x60] sm:$0xff]  ;;  %v235_v4 = vld [vmem:[#allocation2 + $0x78] sm:$0xff] }
  0x8b   : > { %284 = vxpose.xlu0.b32.start [1/16] (narrow) %v236_v6, 64  ;;  %v329_v6 = vld [vmem:[#allocation3 + $0x68] sm:$0xff] }
  0x8f   : > { %285 = vxpose.xlu0.b32.cont [2/16] (narrow) %v237_v7, 64  ;;  %v330_v7 = vld [vmem:[#allocation3 + $0x70] sm:$0xff] }
  0x93   : > { %286 = vxpose.xlu0.b32.cont [3/16] (narrow) %v238_v8, 64 }
  0x96   : > { %380 = vxpose.xlu1.b32.start [1/16] (narrow) %v332_v9, 64 }
  0x97   : > { %287 = vxpose.xlu0.b32.cont [4/16] (narrow) %v239_v10, 64  ;;  %v331_v10 = vld [vmem:[#allocation3 + $0x78] sm:$0xff] }
  0x9a   : > { %381 = vxpose.xlu1.b32.cont [2/16] (narrow) %v333_v11, 64 }
  0x9b   : > { %288 = vxpose.xlu0.b32.cont [5/16] (narrow) %v240_v12, 64 }
  0x9e   : > { %382 = vxpose.xlu1.b32.cont [3/16] (narrow) %v334_v13, 64 }
  0x9f   : > { %289 = vxpose.xlu0.b32.cont [6/16] (narrow) %v241_v14, 64 }
  0xa2   : > { %383 = vxpose.xlu1.b32.cont [4/16] (narrow) %v335_v15, 64 }
  0xa3   : > { %290 = vxpose.xlu0.b32.cont [7/16] (narrow) %v242_v16, 64 }
  0xa6   : > { %384 = vxpose.xlu1.b32.cont [5/16] (narrow) %v336_v17, 64 }
  0xa7   : > { %291 = vxpose.xlu0.b32.cont [8/16] (narrow) %v243_v18, 64 }
  0xaa   : > { %385 = vxpose.xlu1.b32.cont [6/16] (narrow) %v337_v19, 64 }
  0xab   : > { %292 = vxpose.xlu0.b32.cont [9/16] (narrow) %v244_v20, 64 }
  0xae   : > { %386 = vxpose.xlu1.b32.cont [7/16] (narrow) %v338_v21, 64 }
  0xaf   : > { %293 = vxpose.xlu0.b32.cont [10/16] (narrow) %v245_v22, 64 }
  0xb2   : > { %387 = vxpose.xlu1.b32.cont [8/16] (narrow) %v339_v23, 64 }
  0xb3   : > { %294 = vxpose.xlu0.b32.cont [11/16] (narrow) %v246_v24, 64 }
  0xb6   : > { %388 = vxpose.xlu1.b32.cont [9/16] (narrow) %v340_v25, 64 }
  0xb7   : > { %295 = vxpose.xlu0.b32.cont [12/16] (narrow) %v247_v26, 64 }
  0xba   : > { %389 = vxpose.xlu1.b32.cont [10/16] (narrow) %v341_v27, 64 }
  0xbb   : > { %296 = vxpose.xlu0.b32.cont [13/16] (narrow) %v248_v28, 64 }
  0xbe   : > { %390 = vxpose.xlu1.b32.cont [11/16] (narrow) %v342_v29, 64 }
  0xbf   : > { %297 = vxpose.xlu0.b32.cont [14/16] (narrow) %v249_v30, 64 }
  0xc2   : > { %391 = vxpose.xlu1.b32.cont [12/16] (narrow) %v343_v31, 64 }
  0xc3   : > { %298 = vxpose.xlu0.b32.cont [15/16] (narrow) %v250_v32, 64 }
  0xc6   : > { %392 = vxpose.xlu1.b32.cont [13/16] (narrow) %v344_v33, 64  ;;  %v475_v33 = vld [vmem:[%s1246_s5 + $0x28] sm:$0xff] }
  0xc7   : > { %299 = vxpose.xlu0.b32.end [16/16] (narrow) %v251_v34, 64  ;;  %v474_v34 = vld [vmem:[%s1246_s5 + $0x20] sm:$0xff] }
  0xca   : > { %393 = vxpose.xlu1.b32.cont [14/16] (narrow) %v345_v35, 64 }
  0xcb   : > { %252 = vxpose.xlu0.b32.start [1/16] (narrow) %v220_v36, 64 }
  0xce   : > { %394 = vxpose.xlu1.b32.cont [15/16] (narrow) %v346_v37, 64 }
  0xcf   : > { %253 = vxpose.xlu0.b32.cont [2/16] (narrow) %v221_v38, 64  ;;  %v605_v38 = vld [vmem:[%s1246_s5 + $0x38] sm:$0x1] }
  0xd2   : > { %395 = vxpose.xlu1.b32.end [16/16] (narrow) %v347_v39, 64  ;;  %v545_v39 = vld [vmem:[%s1246_s5 + $0x30] sm:$0xff] }
  0xd3   : > { %254 = vxpose.xlu0.b32.cont [3/16] (narrow) %v222_v40, 64 }
  0xd6   : > { %348 = vxpose.xlu1.b32.start [1/16] (narrow) %v316_v41, 64 }
  0xd7   : > { %255 = vxpose.xlu0.b32.cont [4/16] (narrow) %v223_v42, 64 }
  0xda   : > { %349 = vxpose.xlu1.b32.cont [2/16] (narrow) %v317_v43, 64 }
  0xdb   : > { %256 = vxpose.xlu0.b32.cont [5/16] (narrow) %v224_v44, 64 }
  0xde   : > { %350 = vxpose.xlu1.b32.cont [3/16] (narrow) %v318_v45, 64 }
  0xdf   : > { %257 = vxpose.xlu0.b32.cont [6/16] (narrow) %v225_v46, 64 }
  0xe2   : > { %351 = vxpose.xlu1.b32.cont [4/16] (narrow) %v319_v47, 64 }
  0xe3   : > { %258 = vxpose.xlu0.b32.cont [7/16] (narrow) %v226_v48, 64 }
  0xe6   : > { %352 = vxpose.xlu1.b32.cont [5/16] (narrow) %v320_v49, 64 }
  0xe7   : > { %259 = vxpose.xlu0.b32.cont [8/16] (narrow) %v227_v50, 64 }
  0xe8   : > { %v435_v1 = vpop.permute.xlu0 %434  ;;  %v1144_v9 = vpop.permute.xlu1 %444 }
  0xea   : > { %353 = vxpose.xlu1.b32.cont [6/16] (narrow) %v321_v51, 64 }
  0xeb   : > { %260 = vxpose.xlu0.b32.cont [9/16] (narrow) %v228_v52, 64 }
  0xec   : > { %v440_v5 = vpop.permute.xlu0 %439  ;;  %v1146_v12 = vpop.permute.xlu1 %449 }
  0xee   : > { %354 = vxpose.xlu1.b32.cont [7/16] (narrow) %v322_v53, 64 }
  0xef   : > { %261 = vxpose.xlu0.b32.cont [10/16] (narrow) %v229_v54, 64 }
  0xf2   : > { %355 = vxpose.xlu1.b32.cont [8/16] (narrow) %v323_v55, 64 }
  0xf3   : > { %262 = vxpose.xlu0.b32.cont [11/16] (narrow) %v230_v56, 64 }
  0xf6   : > { %356 = vxpose.xlu1.b32.cont [9/16] (narrow) %v324_v57, 64 }
  0xf7   : > { %263 = vxpose.xlu0.b32.cont [12/16] (narrow) %v231_v58, 64 }
  0xfa   : > { %357 = vxpose.xlu1.b32.cont [10/16] (narrow) %v325_v59, 64 }
  0xfb   : > { %264 = vxpose.xlu0.b32.cont [13/16] (narrow) %v232_v60, 64 }
  0xfe   : > { %358 = vxpose.xlu1.b32.cont [11/16] (narrow) %v326_v61, 64 }
  0xff   : > { %265 = vxpose.xlu0.b32.cont [14/16] (narrow) %v233_v62, 64 }
 0x102   : > { %359 = vxpose.xlu1.b32.cont [12/16] (narrow) %v327_v63, 64 }
 0x103   : > { %266 = vxpose.xlu0.b32.cont [15/16] (narrow) %v234_v0, 64 }
 0x106   : > { %360 = vxpose.xlu1.b32.cont [13/16] (narrow) %v328_v2, 64 }
 0x107   : > { %267 = vxpose.xlu0.b32.end [16/16] (narrow) %v235_v4, 64 }
 0x10a   : > { %361 = vxpose.xlu1.b32.cont [14/16] (narrow) %v329_v6, 64 }
 0x10b   : > { %v300_v8 = vpop.trf.xlu0 }
 0x10e   : > { %362 = vxpose.xlu1.b32.cont [15/16] (narrow) %v330_v7, 64 }
 0x10f   : > { %v301_v11 = vpop.trf.xlu0 }
 0x112   : > { %363 = vxpose.xlu1.b32.end [16/16] (narrow) %v331_v10, 64 }
 0x113   : > { %v302_v14 = vpop.trf.xlu0 }
 0x116   : > { %v396_v13 = vpop.trf.xlu1 }
 0x117   : > { %v421_v15 = vadd.f32 %v396_v13, %v300_v8  ;;  %v303_v19 = vpop.trf.xlu0 }
 0x119   : > { %v453_v18 = vadd.f32 %v435_v1, %v421_v15  ;;  %v866_v15 = vld [vmem:[%s1245_s4] sm:$0xff]  }
 0x11a   : > { %v397_v16 = vpop.trf.xlu1 }
 0x11b   : > { %v423_v17 = vadd.f32 %v397_v16, %v301_v11  ;;  %v461_v22 = vmax.f32 %v453_v18, 0.0  ;;  %v304_v24 = vpop.trf.xlu0 }
 0x11d   : > { %v455_v20 = vadd.f32 %v440_v5, %v423_v17 }
 0x11e   : > { %v398_v21 = vpop.trf.xlu1 }
 0x11f   : > { %v463_v23 = vmax.f32 %v455_v20, 0.0  ;;  %v305_v28 = vpop.trf.xlu0  ;;  %v425_v49 = vadd.f32 %v398_v21, %v302_v14 }
 0x121   : > { %v471_v25 = vpack.c.bf16 %v463_v23, %v461_v22  ;;  %v457_v54 = vadd.f32 %v1144_v9, %v425_v49 }
 0x122   : > { %v399_v26 = vpop.trf.xlu1 }
 0x123   : > { %495 = vmatprep.subr.bf16.mxu0 %v471_v25  ;;  %v306_v32 = vpop.trf.xlu0  ;;  %v427_v45 = vadd.f32 %v399_v26, %v303_v19  ;;  %v465_v62 = vmax.f32 %v457_v54, 0.0 }
 0x125   : > { %v459_v50 = vadd.f32 %v1146_v12, %v427_v45 }
 0x126   : > { %v400_v27 = vpop.trf.xlu1 }
 0x127   : > { %v1148_v29 = vmul.f32 %v400_v27, %v304_v24  ;;  %v307_v37 = vpop.trf.xlu0  ;;  %v467_v57 = vmax.f32 %v459_v50, 0.0 }
 0x129   : > { %v473_v4 = vpack.c.bf16 %v467_v57, %v465_v62 }
 0x12a   : > { %v401_v30 = vpop.trf.xlu1 }
 0x12b   : > { %v1150_v31 = vmul.f32 %v401_v30, %v305_v28 }
 0x12e   : > { %v402_v35 = vpop.trf.xlu1 }
 0x12f   : > { %v1158_v36 = vmul.f32 %v402_v35, %v306_v32 }
 0x130   : > { %483 = vperm.xlu1 %865, %v475_v33   ;;  %478 = vperm.xlu0 %864, %v474_v34  }
 0x131   : > { %v602_v40 = vpack.c.bf16 %v1158_v36, %v1150_v31  ;;  %v669_v36 = vlaneseq }
 0x132   : > { %v403_v41 = vpop.trf.xlu1 }
 0x133   : > { %v1168_v42 = vmul.f32 %v403_v41, %v307_v37  ;;  %vm683_vm4 = vcmp.lt.s32.totalorder %v669_v36, 256 }
 0x134   : > { %608 = vperm.xlu1 %865, %v605_v38   ;;  %548 = vperm.xlu0 %864, %v545_v39  }
 0x14b   : > { %v268_v43 = vpop.trf.xlu0 }
 0x14f   : > { %v269_v44 = vpop.trf.xlu0 }
 0x153   : > { %v270_v47 = vpop.trf.xlu0 }
 0x156   : > { %v364_v46 = vpop.trf.xlu1 }
 0x157   : > { %v420_v48 = vadd.f32 %v364_v46, %v268_v43  ;;  %v271_v55 = vpop.trf.xlu0 }
 0x159   : > { %v452_v52 = vadd.f32 %v435_v1, %v420_v48 }
 0x15a   : > { %v365_v51 = vpop.trf.xlu1 }
 0x15b   : > { %v422_v53 = vadd.f32 %v365_v51, %v269_v44  ;;  %v460_v59 = vmax.f32 %v452_v52, 0.0  ;;  %v272_v63 = vpop.trf.xlu0  ;;  %v542_v44 = vld [vmem:[%s1245_s4 + $0x8] sm:$0xf] }
 0x15d   : > { %v454_v56 = vadd.f32 %v440_v5, %v422_v53 }
 0x15e   : > { %v366_v58 = vpop.trf.xlu1 }
 0x15f   : > { %v462_v60 = vmax.f32 %v454_v56, 0.0  ;;  %v424_v61 = vadd.f32 %v366_v58, %v270_v47  ;;  %v273_v10 = vpop.trf.xlu0  ;;  %v598_v58 = vld [vmem:[%s1245_s4 + $0x10] sm:$0x1] }
 0x161   : > { %v470_v0 = vpack.c.bf16 %v462_v60, %v460_v59  ;;  %v456_v6 = vadd.f32 %v1144_v9, %v424_v61  ;;  %v670_v59 = vshrl.u32 %v669_v36, 7 }
 0x162   : > { %v367_v2 = vpop.trf.xlu1 }
 0x163   : > { %v426_v7 = vadd.f32 %v367_v2, %v271_v55  ;;  %496 = vmatpush1.bf16.msra.mxu0 %v470_v0  ;;  %v464_v5 = vmax.f32 %v456_v6, 0.0  ;;  %v274_v9 = vpop.trf.xlu0 }
 0x164   : > { %497 = vmatprep.subr.bf16.mxu0 %v473_v4 }
 0x165   : > { %v458_v1 = vadd.f32 %v1146_v12, %v426_v7 }
 0x166   : > { %v368_v8 = vpop.trf.xlu1 }
 0x167   : > { %v466_v11 = vmax.f32 %v458_v1, 0.0  ;;  %v412_v13 = vmul.f32 %v368_v8, %v272_v63  ;;  %v275_v21 = vpop.trf.xlu0 }
 0x169   : > { %v472_v14 = vpack.c.bf16 %v466_v11, %v464_v5 }
 0x16a   : > { %v369_v16 = vpop.trf.xlu1 }
 0x16b   : > { %498 = vmatpush1.bf16.msra.mxu0 %v472_v14  ;;  %v414_v17 = vmul.f32 %v369_v16, %v273_v10 }
 0x16e   : > { %793 = vmatmul.mubr.msk.bf16.vlgmr.msra.gmra.mrb[0].mxu0 %vm491_vm0, %v866_v15  ;;  %v370_v18 = vpop.trf.xlu1 }
 0x16f   : > { %v416_v19 = vmul.f32 %v370_v18, %v274_v9 }
 0x171   : > { %v601_v20 = vpack.c.bf16 %v416_v19, %v414_v17 }
 0x172   : > { %v371_v12 = vpop.trf.xlu1 }
 0x173   : > { %v418_v22 = vmul.f32 %v371_v12, %v275_v21 }
 0x175   : > { %v603_v56 = vpack.c.bf16 %v418_v22, %v418_v22 }
 0x177   : > { %v617_v57 = vsel %vm615_vm2, %v603_v56, 0 }
 0x1af   : > { %v479_v23 = vpop.permute.xlu0 %478  ;;  %v484_v27 = vpop.permute.xlu1 %483 }
 0x1b3   : > { %v549_v45 = vpop.permute.xlu0 %548 }
 0x241   : > { %v529_v24 = vpop.f32.mrb[0].mxu0 }
 0x242   : > { %v530_v25 = vadd.f32 %v529_v24, %v479_v23  ;;  %v531_v26 = vpop.f32.mrb[1].mxu0 }
 0x243   : > { %v532_v28 = vadd.f32 %v531_v26, %v479_v23  ;;  %v533_v30 = vpop.f32.mrb[2].mxu0 }
 0x244   : > { %v534_v32 = vadd.f32 %v533_v30, %v484_v27  ;;  %v535_v33 = vpop.f32.mrb[3].mxu0  ;;  %v538_v35 = vmax.f32 %v530_v25, 0.0 }
 0x245   : > { %v536_v34 = vadd.f32 %v535_v33, %v484_v27  ;;  %v539_v38 = vmax.f32 %v532_v28, 0.0 }
 0x246   : > { %v540_v37 = vmax.f32 %v534_v32, 0.0 }
 0x247   : > { %v541_v39 = vmax.f32 %v536_v34, 0.0 }
 0x248   : > { %v543_v41 = vpack.c.bf16 %v540_v37, %v538_v35 }
 0x249   : > { %v544_v43 = vpack.c.bf16 %v541_v39, %v539_v38 }
 0x24b   : > { %555 = vmatprep.subr.bf16.mxu1 %v544_v43 }
 0x24c   : > { %556 = vmatpush1.bf16.msra.mxu1 %v543_v41 }
 0x24f   : > { %794 = vmatmul.mubr.msk.bf16.vlgmr.msra.gmra.mrb[0].mxu1 %vm551_vm1, %v542_v44 }
 0x250   : > { %654 = vmatprep.mubr.bf16.mxu1 %v1004_v3  ;;  %v604_v3 = vpack.c.bf16 %v1168_v42, %v1168_v42  ;;  %v609_v42 = vpop.permute.xlu1 %608 }
 0x322   : > { %v589_v46 = vpop.f32.mrb[0].mxu1 }
 0x323   : > { %v590_v47 = vadd.f32 %v589_v46, %v549_v45  ;;  %v591_v48 = vpop.f32.mrb[1].mxu1 }
 0x324   : > { %v592_v49 = vadd.f32 %v591_v48, %v549_v45  ;;  %v593_v50 = vpop.f32.mrb[2].mxu1 }
 0x325   : > { %v596_v51 = vmax.f32 %v590_v47, 0.0  ;;  %v594_v52 = vpop.f32.mrb[3].mxu1 }
 0x326   : > { %v597_v53 = vmax.f32 %v592_v49, 0.0 }
 0x327   : > { %v599_v54 = vpack.c.bf16 %v412_v13, %v596_v51 }
 0x328   : > { %v600_v55 = vpack.c.bf16 %v1148_v29, %v597_v53  ;;  %v1005_v29 = vmov 1966171168  }
 0x329   : > { %v667_v31 = vunpack.c.l.s4 %v1005_v29 }
 0x32a   : > { %622 = vmatprep.subr.bf16.mxu1 %v600_v55 }
 0x32b   : > { %623 = vmatpush1.bf16.msra.mxu1 %v599_v54 }
 0x32c   : > { %624 = vmatprep.subr.bf16.mxu1 %v602_v40  ;;  %v668_v40 = vunpack.c.0.s8 %v667_v31 }
 0x32e   : > { %v671_v0 = vsub.s32 %v668_v40, %v670_v59 }
 0x32f   : > { %625 = vmatpush1.bf16.msra.mxu1 %v601_v20 }
 0x330   : > { %795 = vmatprep.subr.msk.bf16.mxu1 %vm615_vm2, %v604_v3 }
 0x333   : > { %627 = vmatpush1.bf16.msra.mxu1 %v617_v57 }
 0x336   : > { %796 = vmatmul.mubr.msk.bf16.vlgmr.msra.gmra.mrb[4].mxu1 %vm611_vm3, %v598_v58 }
 0x409   : > { %v656_v60 = vpop.f32.mrb[4].mxu1 }
 0x40a   : > { %v657_v61 = vadd.f32 %v656_v60, %v609_v42  ;;  %v658_v62 = vpop.f32.mrb[5].mxu1 }
 0x40b   : > { %v659_v63 = vadd.f32 %v658_v62, %v609_v42  ;;  %v660_v2 = vpop.f32.mrb[6].mxu1 }
 0x40c   : > { %v661_v4 = vpop.f32.mrb[7].mxu1 }
 0x40d   : > { %v665_v6 = vcombine.low %v657_v61, %v659_v63 }
 0x40f   : > { %v672_v7 = vrot.slane %v665_v6, %v671_v0 }
 0x411   : > { %v679_v1 = vrot.slane %v672_v7, %v671_v0 }
 0x413   : > { %685 = vst.msk [vmem:[%s1255_s25] sm:$0x3] %vm683_vm4, %v679_v1 }
 0x414   : > { %928 = shalt.err (!%p925_p12)
}
 0x415   : > { %s929_s19 = scalar_lea.hbm %s1196_s24, 32  ;;  %s933_s20 = scalar_lea.hbm %s1247_s6, 64 }
 0x416   : > { %p930_p13 = scmp.ne.s32.totalorder %s1196_s24, %s929_s19  ;;  %p934_p4 = scmp.lt.u32.totalorder %s1196_s24, %s1247_s6 }
 0x417   : > { %p935_p5 = scmp.lt.u32.totalorder %s933_s20, %s929_s19  ;;  %p937_p2 = scmp.lt.u32.totalorder %s929_s19, %s1196_s24 }
 0x418   : > { %p931_p0 = pnand %p930_p13, %p1086_p1 }
 0x419   : > { %p936_p6 = por %p935_p5, %p934_p4 }
 0x41a   : > { %p932_p3 = pneg %p931_p0 }
 0x41b   : > { %p938_p7 = por %p937_p2, %p936_p6 }
 0x41d   : > { %p939_p8 = pnand %p938_p7, %p932_p3 }
 0x41f   : > { %942 = shalt.err (!%p939_p8)
}
 0x420   : > { %805 = dma.vmem_to_hbm [thread:$0]  (%p1086_p1), %s1198_s12, 32, %s1196_s24, %s687_s26  }
 0x421 PF: > { %p811_p9 = scmp.ge.s32.totalorder %s991_s8, 2  ;;  %s713_s0 = sand.u32 1, %s979_s1  }
 0x422   : > { %p1257_p10 = scmp.ne.s32.totalorder %s1252_s16, 0  ;;  %s714_s10 = scalar_lea.sflag [#allocation9], %s713_s0 }
 0x424   : > { %p808_p11 = pnand %p811_p9, %p1257_p10 }
 0x426   : > { %974 = dma.done.wait (!%p808_p11), %s714_s10, 32  }
 0x427   : > { %976 = vsyncadd (!%p808_p11), %s714_s10, 4294967264  ;;  %s1258_s13 = sld [smem:[#allocation19_spill]]  ;;  %p26_p12 = scmp.ge.s32.totalorder %s1073_s11, 4  }
 0x428   : > { %s1259_s1 = smov %s983_s30  ;;  %s1260_s30 = smov %s987_s7 }
 0x429   : > { %s1262_s8 = smov %s1073_s11  ;;  %28 = sbr.rel (!%p26_p12) target bundleno = 28 (0x1c), region = 147 }
 0x42d   : > { %s1261_s7 = smov %s1258_s13 }
 0x430   :  { %719 = vsyncpa [#allocation9], 1 }
 0x431   :  { %721 = vsyncpa [#allocation9 + $0x1], 1 }
 0x432   :  { %722 = vsyncmov [#allocation4] }
 0x435   :  { %s723_s8 = vpop.sfrf %722 }
 0x436   :  { %p802_p1 = scmp.ne.s32.totalorder %s723_s8, 0 }
 0x438   :  { %727 = shalt.err (%p802_p1)  }
 0x439   :  { %729 = vsyncmov [#allocation4 + $0x1] }
 0x43c   :  { %s730_s15 = vpop.sfrf %729 }
 0x43d   :  { %p803_p13 = scmp.ne.s32.totalorder %s730_s15, 0 }
 0x43f   :  { %734 = shalt.err (%p803_p13)  }

</bundles_post_ra>
